<compile_context>
chip_gen: v5e
topology: v5e:2x2
jax: 0.10.0
libtpu: 0.0.40
codegen_flags: <defaults>
</compile_context>

<pallas_src>
import functools

import jax
import jax.numpy as jnp
from jax.experimental import pallas as pl
from jax.experimental.pallas import tpu as pltpu

INPUT_DIM = 128
NUM_HIDDEN = 128
NUM_LAYERS = 3
NUM_CLASSES = 3
OUT_PAD = 128            # pad classifier output dim to one full lane register
DEFAULT_TILE_B = 4096    # sweep 4096-8192 on v6e/v7x; VMEM is not binding


def _round_up(n, m):
    return ((n + m - 1) // m) * m


def _choose_tile_b(batch, tile_b):
    """Tile is a multiple of 16 (bf16 sublane packing); keep >=2 grid steps
    when the batch allows so megacore 'parallel' sharding has work for both
    TensorCores on v7x (no-op elsewhere)."""
    tile_b = max(16, (tile_b // 16) * 16)
    tile_b = min(tile_b, _round_up(batch, 16))
    if batch > 16 and pl.cdiv(batch, tile_b) < 2:
        tile_b = _round_up(pl.cdiv(batch, 2), 16)
    return tile_b


def deep_resnet_kernel(x_ref, w_in_ref, b_in_ref, w_res_ref, b_res_ref,
                       w_out_ref, b_out_ref, o_ref):
    # x_ref:     (TILE_B, INPUT_DIM) f32
    # w_in_ref:  (INPUT_DIM, NUM_HIDDEN) bf16      b_in_ref:  (1, NUM_HIDDEN) f32
    # w_res_ref: (NUM_LAYERS, NUM_HIDDEN, NUM_HIDDEN) bf16
    # b_res_ref: (NUM_LAYERS, 1, NUM_HIDDEN) f32
    # w_out_ref: (NUM_HIDDEN, OUT_PAD) bf16        b_out_ref: (1, OUT_PAD) f32
    # o_ref:     (TILE_B, OUT_PAD) bf16
    x = x_ref[...].astype(jnp.bfloat16)            # in-kernel cast (hidden under MXU)

    # input layer: f32 MXU accumulation + f32 bias, relu, then bf16 residual stream
    h = jnp.dot(x, w_in_ref[...], preferred_element_type=jnp.float32) + b_in_ref[...]
    h = jnp.maximum(h, 0.0).astype(jnp.bfloat16)

    # residual dense blocks (static unroll; NUM_LAYERS=3)
    for i in range(NUM_LAYERS):
        r = jnp.dot(h, w_res_ref[i],
                    preferred_element_type=jnp.float32) + b_res_ref[i]
        # dropout is identity in eval mode
        h = h + jnp.maximum(r, 0.0).astype(jnp.bfloat16)

    # classifier (output zero-padded to OUT_PAD lanes -> lane-dense bf16 store)
    logits = jnp.dot(h, w_out_ref[...],
                     preferred_element_type=jnp.float32) + b_out_ref[...]
    o_ref[...] = logits.astype(o_ref.dtype)


@functools.partial(jax.jit, static_argnames=("tile_b",))
def deep_resnet_forward(x, params, tile_b=DEFAULT_TILE_B):
    """x: (B, INPUT_DIM) float32. Returns logits (B, NUM_CLASSES) float32."""
    B = x.shape[0]
    tile_b = _choose_tile_b(B, tile_b)
    grid = (pl.cdiv(B, tile_b),)   # ragged last tile: OOB rows computed & store-dropped

    w_in = params["w_in"].astype(jnp.bfloat16)
    w_res = params["w_res"].astype(jnp.bfloat16)
    w_out = params["w_out"].astype(jnp.bfloat16)
    b_in, b_res, b_out = params["b_in"], params["b_res"], params["b_out"]

    def resident(*shape):
        # Full-array block with a constant index_map -> fetched once, VMEM-resident.
        return pl.BlockSpec(shape, lambda i: (0,) * len(shape))

    weight_bytes = (w_in.size + w_res.size + w_out.size) * 2 \
        + (b_in.size + b_res.size + b_out.size) * 4
    cost = pl.CostEstimate(
        flops=2 * B * NUM_HIDDEN * NUM_HIDDEN * (NUM_LAYERS + 2),
        transcendentals=0,
        bytes_accessed=x.size * 4 + B * OUT_PAD * 2 + weight_bytes,
    )

    out_padded = pl.pallas_call(
        deep_resnet_kernel,
        out_shape=jax.ShapeDtypeStruct((B, OUT_PAD), jnp.bfloat16),
        grid=grid,
        in_specs=[
            pl.BlockSpec((tile_b, INPUT_DIM), lambda i: (i, 0)),   # x: streamed f32
            resident(INPUT_DIM, NUM_HIDDEN),                       # w_in
            resident(1, NUM_HIDDEN),                               # b_in
            resident(NUM_LAYERS, NUM_HIDDEN, NUM_HIDDEN),          # w_res
            resident(NUM_LAYERS, 1, NUM_HIDDEN),                   # b_res
            resident(NUM_HIDDEN, OUT_PAD),                         # w_out
            resident(1, OUT_PAD),                                  # b_out
        ],
        out_specs=pl.BlockSpec((tile_b, OUT_PAD), lambda i: (i, 0)),
        compiler_params=pltpu.CompilerParams(
            dimension_semantics=("parallel",),          # megacore batch sharding
            vmem_limit_bytes=48 * 1024 * 1024,          # lift v5e's 16 MiB scoped default
        ),
        cost_estimate=cost,
    )(x, w_in, b_in, w_res, b_res, w_out, b_out)

    # bf16 padded logits -> slice the 3 real classes, cast to f32 afterwards
    return out_padded[:B, :NUM_CLASSES].astype(jnp.float32)


def init_params(key):
    """Deterministic PyTorch-Linear-style init (uniform +-1/sqrt(fan_in)).
    Weights stored pre-transposed as [in, out], in float32."""
    keys = jax.random.split(key, 2 + 2 * NUM_LAYERS + 2)

    def linear(kw, kb, fan_in, fan_out):
        bound = 1.0 / jnp.sqrt(jnp.float32(fan_in))
        w = jax.random.uniform(kw, (fan_in, fan_out), jnp.float32, -bound, bound)
        b = jax.random.uniform(kb, (1, fan_out), jnp.float32, -bound, bound)
        return w, b

    w_in, b_in = linear(keys[0], keys[1], INPUT_DIM, NUM_HIDDEN)

    w_res_list, b_res_list = [], []
    for i in range(NUM_LAYERS):
        w, b = linear(keys[2 + 2 * i], keys[3 + 2 * i], NUM_HIDDEN, NUM_HIDDEN)
        w_res_list.append(w)
        b_res_list.append(b)
    w_res = jnp.stack(w_res_list, axis=0)                 # (L, H, H)
    b_res = jnp.stack(b_res_list, axis=0)                 # (L, 1, H)

    w_cls, b_cls = linear(keys[-2], keys[-1], NUM_HIDDEN, NUM_CLASSES)
    # zero-pad classifier to OUT_PAD lanes (lane-dense stores in the kernel)
    w_out = jnp.zeros((NUM_HIDDEN, OUT_PAD), jnp.float32).at[:, :NUM_CLASSES].set(w_cls)
    b_out = jnp.zeros((1, OUT_PAD), jnp.float32).at[:, :NUM_CLASSES].set(b_cls)

    return dict(w_in=w_in, b_in=b_in, w_res=w_res, b_res=b_res,
                w_out=w_out, b_out=b_out)


def reference_forward(x, params):
    """Pure-JAX f32 reference of the PyTorch forward (eval mode)."""
    h = jnp.maximum(x @ params["w_in"] + params["b_in"], 0.0)
    for i in range(NUM_LAYERS):
        r = jnp.maximum(h @ params["w_res"][i] + params["b_res"][i], 0.0)
        h = h + r
    return (h @ params["w_out"] + params["b_out"])[:, :NUM_CLASSES]


if __name__ == "__main__":
    key = jax.random.PRNGKey(0)
    k_param, k_x = jax.random.split(key)
    params = init_params(k_param)

    # Small demo batch that is NOT a multiple of the tile so the ragged-tail
    # path is exercised; tile_b=16 forces a 2-step grid (resident weights,
    # pipelined x/out, OOB rows dropped on store).
    B = 20
    x = jax.random.normal(k_x, (B, INPUT_DIM), jnp.float32)

    logits = deep_resnet_forward(x, params, tile_b=16)
    logits = jax.block_until_ready(logits)

    ref = reference_forward(x, params)
    assert logits.shape == (B, NUM_CLASSES)
    # bf16 inputs/weights/residual-stream/output with f32 MXU accumulation
    # -> relaxed tolerance vs the pure-f32 reference
    max_err = float(jnp.max(jnp.abs(logits - ref)))
    assert jnp.allclose(logits, ref, atol=1e-1, rtol=1e-1), max_err
    print("KERNEL_OK")
</pallas_src>

<mosaic_0001>
module attributes {stable_mosaic.version = 11 : i64} {
  func.func @deep_resnet_kernel(%arg0: i32, %arg1: memref<16x128xf32, #tpu.memory_space<vmem>>, %arg2: memref<128x128xbf16, #tpu.memory_space<vmem>>, %arg3: memref<1x128xf32, #tpu.memory_space<vmem>>, %arg4: memref<3x128x128xbf16, #tpu.memory_space<vmem>>, %arg5: memref<3x1x128xf32, #tpu.memory_space<vmem>>, %arg6: memref<128x128xbf16, #tpu.memory_space<vmem>>, %arg7: memref<1x128xf32, #tpu.memory_space<vmem>>, %arg8: memref<16x128xbf16, #tpu.memory_space<vmem>>) attributes {dimension_semantics = [#tpu.dimension_semantics<parallel>], iteration_bounds = array<i64: 2>, scalar_prefetch = 0 : i64, scratch_operands = 0 : i64, tpu.core_type = #tpu.core_type<tc>, window_params = [{transform_indices = @transform_0, window_bounds = array<i64: 16, 128>}, {pipeline_mode = #tpu.pipeline_mode<synchronous>, transform_indices = @transform_1, window_bounds = array<i64: 128, 128>}, {pipeline_mode = #tpu.pipeline_mode<synchronous>, transform_indices = @transform_2, window_bounds = array<i64: 1, 128>}, {pipeline_mode = #tpu.pipeline_mode<synchronous>, transform_indices = @transform_3, window_bounds = array<i64: 3, 128, 128>}, {pipeline_mode = #tpu.pipeline_mode<synchronous>, transform_indices = @transform_4, window_bounds = array<i64: 3, 1, 128>}, {pipeline_mode = #tpu.pipeline_mode<synchronous>, transform_indices = @transform_5, window_bounds = array<i64: 128, 128>}, {pipeline_mode = #tpu.pipeline_mode<synchronous>, transform_indices = @transform_6, window_bounds = array<i64: 1, 128>}, {transform_indices = @transform_7, window_bounds = array<i64: 16, 128>}]} {
    %c0 = arith.constant 0 : index
    %c0_0 = arith.constant 0 : index
    %0 = vector.load %arg1[%c0, %c0_0] : memref<16x128xf32, #tpu.memory_space<vmem>>, vector<16x128xf32>
    %1 = arith.truncf %0 : vector<16x128xf32> to vector<16x128xbf16>
    %c0_1 = arith.constant 0 : index
    %c0_2 = arith.constant 0 : index
    %2 = vector.load %arg2[%c0_1, %c0_2] : memref<128x128xbf16, #tpu.memory_space<vmem>>, vector<128x128xbf16>
    %cst = arith.constant dense<0.000000e+00> : vector<16x128xf32>
    %3 = tpu.matmul %1, %2, %cst {dimension_numbers = #tpu.dot_dimension_numbers<[1], [0], [0], [1], [0, 0, 1, 1], [], []>} : vector<16x128xbf16>, vector<128x128xbf16>, vector<16x128xf32> -> vector<16x128xf32>
    %c0_3 = arith.constant 0 : index
    %c0_4 = arith.constant 0 : index
    %4 = vector.load %arg3[%c0_3, %c0_4] : memref<1x128xf32, #tpu.memory_space<vmem>>, vector<1x128xf32>
    %5 = vector.broadcast %4 : vector<1x128xf32> to vector<16x128xf32>
    %6 = arith.addf %3, %5 : vector<16x128xf32>
    %cst_5 = arith.constant 0.000000e+00 : f32
    %7 = vector.broadcast %cst_5 : f32 to vector<16x128xf32>
    %8 = arith.maximumf %6, %7 : vector<16x128xf32>
    %9 = arith.truncf %8 : vector<16x128xf32> to vector<16x128xbf16>
    %c0_6 = arith.constant 0 : index
    %c0_7 = arith.constant 0 : index
    %c0_8 = arith.constant 0 : index
    %10 = vector.load %arg4[%c0_6, %c0_7, %c0_8] : memref<3x128x128xbf16, #tpu.memory_space<vmem>>, vector<1x128x128xbf16>
    %11 = vector.shape_cast %10 : vector<1x128x128xbf16> to vector<128x128xbf16>
    %cst_9 = arith.constant dense<0.000000e+00> : vector<16x128xf32>
    %12 = tpu.matmul %9, %11, %cst_9 {dimension_numbers = #tpu.dot_dimension_numbers<[1], [0], [0], [1], [0, 0, 1, 1], [], []>} : vector<16x128xbf16>, vector<128x128xbf16>, vector<16x128xf32> -> vector<16x128xf32>
    %c0_10 = arith.constant 0 : index
    %c0_11 = arith.constant 0 : index
    %c0_12 = arith.constant 0 : index
    %13 = vector.load %arg5[%c0_10, %c0_11, %c0_12] : memref<3x1x128xf32, #tpu.memory_space<vmem>>, vector<1x1x128xf32>
    %14 = vector.shape_cast %13 : vector<1x1x128xf32> to vector<1x128xf32>
    %15 = vector.broadcast %14 : vector<1x128xf32> to vector<16x128xf32>
    %16 = arith.addf %12, %15 : vector<16x128xf32>
    %cst_13 = arith.constant 0.000000e+00 : f32
    %17 = vector.broadcast %cst_13 : f32 to vector<16x128xf32>
    %18 = arith.maximumf %16, %17 : vector<16x128xf32>
    %19 = arith.truncf %18 : vector<16x128xf32> to vector<16x128xbf16>
    %20 = arith.addf %9, %19 : vector<16x128xbf16>
    %c1 = arith.constant 1 : index
    %c0_14 = arith.constant 0 : index
    %c0_15 = arith.constant 0 : index
    %21 = vector.load %arg4[%c1, %c0_14, %c0_15] : memref<3x128x128xbf16, #tpu.memory_space<vmem>>, vector<1x128x128xbf16>
    %22 = vector.shape_cast %21 : vector<1x128x128xbf16> to vector<128x128xbf16>
    %cst_16 = arith.constant dense<0.000000e+00> : vector<16x128xf32>
    %23 = tpu.matmul %20, %22, %cst_16 {dimension_numbers = #tpu.dot_dimension_numbers<[1], [0], [0], [1], [0, 0, 1, 1], [], []>} : vector<16x128xbf16>, vector<128x128xbf16>, vector<16x128xf32> -> vector<16x128xf32>
    %c1_17 = arith.constant 1 : index
    %c0_18 = arith.constant 0 : index
    %c0_19 = arith.constant 0 : index
    %24 = vector.load %arg5[%c1_17, %c0_18, %c0_19] : memref<3x1x128xf32, #tpu.memory_space<vmem>>, vector<1x1x128xf32>
    %25 = vector.shape_cast %24 : vector<1x1x128xf32> to vector<1x128xf32>
    %26 = vector.broadcast %25 : vector<1x128xf32> to vector<16x128xf32>
    %27 = arith.addf %23, %26 : vector<16x128xf32>
    %cst_20 = arith.constant 0.000000e+00 : f32
    %28 = vector.broadcast %cst_20 : f32 to vector<16x128xf32>
    %29 = arith.maximumf %27, %28 : vector<16x128xf32>
    %30 = arith.truncf %29 : vector<16x128xf32> to vector<16x128xbf16>
    %31 = arith.addf %20, %30 : vector<16x128xbf16>
    %c2 = arith.constant 2 : index
    %c0_21 = arith.constant 0 : index
    %c0_22 = arith.constant 0 : index
    %32 = vector.load %arg4[%c2, %c0_21, %c0_22] : memref<3x128x128xbf16, #tpu.memory_space<vmem>>, vector<1x128x128xbf16>
    %33 = vector.shape_cast %32 : vector<1x128x128xbf16> to vector<128x128xbf16>
    %cst_23 = arith.constant dense<0.000000e+00> : vector<16x128xf32>
    %34 = tpu.matmul %31, %33, %cst_23 {dimension_numbers = #tpu.dot_dimension_numbers<[1], [0], [0], [1], [0, 0, 1, 1], [], []>} : vector<16x128xbf16>, vector<128x128xbf16>, vector<16x128xf32> -> vector<16x128xf32>
    %c2_24 = arith.constant 2 : index
    %c0_25 = arith.constant 0 : index
    %c0_26 = arith.constant 0 : index
    %35 = vector.load %arg5[%c2_24, %c0_25, %c0_26] : memref<3x1x128xf32, #tpu.memory_space<vmem>>, vector<1x1x128xf32>
    %36 = vector.shape_cast %35 : vector<1x1x128xf32> to vector<1x128xf32>
    %37 = vector.broadcast %36 : vector<1x128xf32> to vector<16x128xf32>
    %38 = arith.addf %34, %37 : vector<16x128xf32>
    %cst_27 = arith.constant 0.000000e+00 : f32
    %39 = vector.broadcast %cst_27 : f32 to vector<16x128xf32>
    %40 = arith.maximumf %38, %39 : vector<16x128xf32>
    %41 = arith.truncf %40 : vector<16x128xf32> to vector<16x128xbf16>
    %42 = arith.addf %31, %41 : vector<16x128xbf16>
    %c0_28 = arith.constant 0 : index
    %c0_29 = arith.constant 0 : index
    %43 = vector.load %arg6[%c0_28, %c0_29] : memref<128x128xbf16, #tpu.memory_space<vmem>>, vector<128x128xbf16>
    %cst_30 = arith.constant dense<0.000000e+00> : vector<16x128xf32>
    %44 = tpu.matmul %42, %43, %cst_30 {dimension_numbers = #tpu.dot_dimension_numbers<[1], [0], [0], [1], [0, 0, 1, 1], [], []>} : vector<16x128xbf16>, vector<128x128xbf16>, vector<16x128xf32> -> vector<16x128xf32>
    %c0_31 = arith.constant 0 : index
    %c0_32 = arith.constant 0 : index
    %45 = vector.load %arg7[%c0_31, %c0_32] : memref<1x128xf32, #tpu.memory_space<vmem>>, vector<1x128xf32>
    %46 = vector.broadcast %45 : vector<1x128xf32> to vector<16x128xf32>
    %47 = arith.addf %44, %46 : vector<16x128xf32>
    %48 = arith.truncf %47 : vector<16x128xf32> to vector<16x128xbf16>
    %c0_33 = arith.constant 0 : index
    %c0_34 = arith.constant 0 : index
    %49 = vector.load %arg8[%c0_33, %c0_34] : memref<16x128xbf16, #tpu.memory_space<vmem>>, vector<16x128xbf16>
    tpu.vector_store %arg8[%c0_33, %c0_34], %48 {strides = array<i32>} : memref<16x128xbf16, #tpu.memory_space<vmem>>, vector<16x128xbf16>,
    return
  }
  func.func @transform_0(%arg0: i32) -> (i32, i32) {
    %c0_i32 = arith.constant 0 : i32
    %c0_i32_0 = arith.constant 0 : i32
    return %arg0, %c0_i32 : i32, i32
  }
  func.func @transform_1(%arg0: i32) -> (i32, i32) {
    %c0_i32 = arith.constant 0 : i32
    %c0_i32_0 = arith.constant 0 : i32
    %c0_i32_1 = arith.constant 0 : i32
    return %c0_i32, %c0_i32_0 : i32, i32
  }
  func.func @transform_2(%arg0: i32) -> (i32, i32) {
    %c0_i32 = arith.constant 0 : i32
    %c0_i32_0 = arith.constant 0 : i32
    %c0_i32_1 = arith.constant 0 : i32
    return %c0_i32, %c0_i32_0 : i32, i32
  }
  func.func @transform_3(%arg0: i32) -> (i32, i32, i32) {
    %c0_i32 = arith.constant 0 : i32
    %c0_i32_0 = arith.constant 0 : i32
    %c0_i32_1 = arith.constant 0 : i32
    %c0_i32_2 = arith.constant 0 : i32
    return %c0_i32, %c0_i32_0, %c0_i32_1 : i32, i32, i32
  }
  func.func @transform_4(%arg0: i32) -> (i32, i32, i32) {
    %c0_i32 = arith.constant 0 : i32
    %c0_i32_0 = arith.constant 0 : i32
    %c0_i32_1 = arith.constant 0 : i32
    %c0_i32_2 = arith.constant 0 : i32
    return %c0_i32, %c0_i32_0, %c0_i32_1 : i32, i32, i32
  }
  func.func @transform_5(%arg0: i32) -> (i32, i32) {
    %c0_i32 = arith.constant 0 : i32
    %c0_i32_0 = arith.constant 0 : i32
    %c0_i32_1 = arith.constant 0 : i32
    return %c0_i32, %c0_i32_0 : i32, i32
  }
  func.func @transform_6(%arg0: i32) -> (i32, i32) {
    %c0_i32 = arith.constant 0 : i32
    %c0_i32_0 = arith.constant 0 : i32
    %c0_i32_1 = arith.constant 0 : i32
    return %c0_i32, %c0_i32_0 : i32, i32
  }
  func.func @transform_7(%arg0: i32) -> (i32, i32) {
    %c0_i32 = arith.constant 0 : i32
    %c0_i32_0 = arith.constant 0 : i32
    return %arg0, %c0_i32 : i32, i32
  }
}

</mosaic_0001>

<bundles_post_ra>
// kernel: deep_resnet_forward.1
= control target key start
LH: loop header
LB: loop body
LE: loop exit
PB: predicated region body
PF: predicated region fallthrough
CT: control target
= control target key end

     0   :  { %s1485_s24 = smov 0   ;;  %s1487_s25 = smov 0   ;;  %s1702_s0 = inlined_call_operand.vmem [shape: f32[20,128], index: 0, kind: input, shape index: {}]   ;;  %s1703_s1 = inlined_call_operand.vmem [shape: bf16[128,128], index: 1, kind: input, shape index: {}]   ;;  %s1704_s2 = inlined_call_operand.vmem [shape: f32[1,128], index: 2, kind: input, shape index: {}]   ;;  %s1705_s3 = inlined_call_operand.vmem [shape: bf16[3,128,128], index: 3, kind: input, shape index: {}]   ;;  %s1706_s4 = inlined_call_operand.vmem [shape: f32[3,1,128], index: 4, kind: input, shape index: {}]   ;;  %s1707_s5 = inlined_call_operand.vmem [shape: bf16[128,128], index: 5, kind: input, shape index: {}]   ;;  %s1708_s6 = inlined_call_operand.vmem [shape: f32[1,128], index: 6, kind: input, shape index: {}]   ;;  %s1709_s7 = inlined_call_operand.vmem [shape: bf16[20,128], index: 7, kind: output, shape index: {}]  }
   0x1   :  { %s1489_s26 = smov 0  }
   0x2 LB: > { %s1498_s27 = sadd.s32 4294967295, %s1411_s26   ;;  %s1500_s28 = sadd.s32 1, %s1411_s26   ;;  %s1411_s26 = sphi %s1489_s26, %s1713_s26   ;;  %s1407_s25 = sphi %s1487_s25, %s1712_s25   ;;  %s1403_s24 = sphi %s1485_s24, %s1711_s24  }
   0x3   : > { %s173_s29 = ssub.s32 %s1411_s26, %s1500_s28  ;;  %s176_s30 = sadd.s32 1, %s1407_s25 }
   0x4   : > { %p174_p0 = scmp.eq.s32.totalorder %s173_s29, 0  ;;  %p186_p1 = scmp.ne.s32.totalorder %s1407_s25, %s1403_s24 }
   0x5   : > { %p187_p2 = scmp.eq.s32.totalorder %s1498_s27, 1  ;;  %p1001_p3 = scmp.ge.s32.totalorder %s1411_s26, 1 }
   0x6   : > { %s1508_s8 = scalar_select %p174_p0, %s1407_s25, %s176_s30  }
   0x7   : > { %p1510_p4 = por %p187_p2, %p186_p1  ;;  %p246_p5 = scmp.lt.s32.totalorder %s1411_s26, 3 }
   0x9   : > { %p247_p6 = pnand %p1001_p3, %p246_p5 }
   0xa   : > { %s1533_s22 = sshll.u32 (!%p247_p6), %s1498_s27, 1  ;;  %s278_s26 = sand.u32 (!%p247_p6), 1, %s1403_s24  }
   0xb   : > { %250 = sbr.rel (%p247_p6) target bundleno = 828 (0x33c), region = 48  ;;  %p286_p7 = scmp.lt.s32.totalorder (!%p247_p6), %s1533_s22, 2 }
  0x10   : > { %v1223_v0 = vld [vmem:[%s1703_s1 + $0x38] sm:$0xff]  ;;  %v1222_v1 = vld [vmem:[%s1703_s1 + $0x30] sm:$0xff]  ;;  %v1221_v4 = vld [vmem:[%s1703_s1 + $0x28] sm:$0xff]  ;;  %s287_s10 = scalar_select %p286_p7, %s1533_s22, 2 }
  0x11   : > { %371 = vmatpush.bf16.msra.mxu0 %v1223_v0  ;;  %v1231_v2 = vld [vmem:[%s1705_s3 + $0x38] sm:$0xff]  ;;  %v1230_v3 = vld [vmem:[%s1705_s3 + $0x30] sm:$0xff]  ;;  %v1229_v5 = vld [vmem:[%s1705_s3 + $0x28] sm:$0xff]  ;;  %s786_s12 = ssub.s32 (%p1510_p4), 3, %s1533_s22  ;;  %s1256_s24 = sshll.u32 (%p1510_p4), %s1498_s27, 3 }
  0x12   : > { %463 = vmatpush.bf16.msra.mxu1 %v1231_v2  ;;  %v1220_v6 = vld [vmem:[%s1703_s1 + $0x20] sm:$0xff]  ;;  %v1219_v7 = vld [vmem:[%s1703_s1 + $0x18] sm:$0xff]  ;;  %v1218_v8 = vld [vmem:[%s1703_s1 + $0x10] sm:$0xff]  ;;  %s1004_s13 = sshll.u32 %s287_s10, 3  ;;  %s1002_s10 = sshll.u32 %s278_s26, 3 }
  0x13   : > { %v1217_v9 = vld [vmem:[%s1703_s1 + $0x8] sm:$0xff]  ;;  %s289_s18 = scalar_lea.vmem %s1702_s0, %s1004_s13  ;;  %v1216_v10 = vld [vmem:[%s1703_s1] sm:$0xff]  ;;  %v1227_v15 = vld [vmem:[%s1705_s3 + $0x18] sm:$0xff]  ;;  %s1658_s11 = scalar_lea.vmem [#allocation2], %s1002_s10  }
  0x14   : > { %v300_v11 = vld [vmem:[%s289_s18] sm:$0xff]  ;;  %v301_v12 = vld [vmem:[%s289_s18 + $0x8] sm:$0xff]  ;;  %v1226_v16 = vld [vmem:[%s1705_s3 + $0x10] sm:$0xff]  ;;  %p787_p8 = scmp.lt.s32.totalorder (%p1510_p4), %s786_s12, 2  ;;  %s1668_s15 = scalar_lea.vmem (%p1510_p4), %s1709_s7, %s1256_s24  }
  0x15   : > { %372 = vmatpush.bf16.msra.mxu0 %v1222_v1  ;;  %v302_v13 = vpack.c.bf16 %v301_v12, %v300_v11  ;;  %v1228_v14 = vld [vmem:[%s1705_s3 + $0x20] sm:$0xff]  ;;  %v1225_v17 = vld [vmem:[%s1705_s3 + $0x8] sm:$0xff]  ;;  %v1239_v19 = vld [vmem:[%s1705_s3 + $0x78] sm:$0xff] }
  0x16   : > { %464 = vmatpush.bf16.msra.mxu1 %v1230_v3  ;;  %v1224_v18 = vld [vmem:[%s1705_s3] sm:$0xff]  ;;  %565 = vmatpush.bf16.msra.mxu2 %v1239_v19  ;;  %v1238_v20 = vld [vmem:[%s1705_s3 + $0x70] sm:$0xff]  ;;  %v1237_v33 = vld [vmem:[%s1705_s3 + $0x68] sm:$0xff] }
  0x17   : > { %v1352_v21 = vld [vmem:[%s1704_s2] ss:$0 sm:$0xff]  ;;  %v1235_v35 = vld [vmem:[%s1705_s3 + $0x58] sm:$0xff]  ;;  %v1234_v36 = vld [vmem:[%s1705_s3 + $0x50] sm:$0xff] }
  0x18   : > { %v1236_v34 = vld [vmem:[%s1705_s3 + $0x60] sm:$0xff]  ;;  %v1233_v37 = vld [vmem:[%s1705_s3 + $0x48] sm:$0xff]  ;;  %v1247_v39 = vld [vmem:[%s1705_s3 + $0xb8] sm:$0xff] }
  0x19   : > { %373 = vmatpush.bf16.msra.mxu0 %v1221_v4  ;;  %v1232_v38 = vld [vmem:[%s1705_s3 + $0x40] sm:$0xff]  ;;  %667 = vmatpush.bf16.msra.mxu3 %v1247_v39  ;;  %v1246_v40 = vld [vmem:[%s1705_s3 + $0xb0] sm:$0xff]  ;;  %v1245_v61 = vld [vmem:[%s1705_s3 + $0xa8] sm:$0xff] }
  0x1a   : > { %465 = vmatpush.bf16.msra.mxu1 %v1229_v5  ;;  %566 = vmatpush.bf16.msra.mxu2 %v1238_v20  ;;  %v1353_v41 = vld [vmem:[%s1706_s4] ss:$0 sm:$0xff]  ;;  %v1243_v63 = vld [vmem:[%s1705_s3 + $0x98] sm:$0xff]  ;;  %v1242_v0 = vld [vmem:[%s1705_s3 + $0x90] sm:$0xff] }
  0x1b   : > { %v1244_v62 = vld [vmem:[%s1705_s3 + $0xa0] sm:$0xff]  ;;  %v1241_v1 = vld [vmem:[%s1705_s3 + $0x88] sm:$0xff]  ;;  %v1255_v3 = vld [vmem:[%s1707_s5 + $0x38] sm:$0xff] }
  0x1c   : > { %v1240_v2 = vld [vmem:[%s1705_s3 + $0x80] sm:$0xff]  ;;  %v1254_v4 = vld [vmem:[%s1707_s5 + $0x30] sm:$0xff] }
  0x1d   : > { %374 = vmatpush.bf16.msra.mxu0 %v1220_v6  ;;  %668 = vmatpush.bf16.msra.mxu3 %v1246_v40  ;;  %v1354_v5 = vld [vmem:[%s1706_s4 + $0x1] ss:$0 sm:$0xff]  ;;  %v1253_v6 = vld [vmem:[%s1707_s5 + $0x28] sm:$0xff] }
  0x1e   : > { %466 = vmatpush.bf16.msra.mxu1 %v1228_v14  ;;  %567 = vmatpush.bf16.msra.mxu2 %v1237_v33 }
  0x21   : > { %375 = vmatpush.bf16.msra.mxu0 %v1219_v7  ;;  %669 = vmatpush.bf16.msra.mxu3 %v1245_v61 }
  0x22   : > { %467 = vmatpush.bf16.msra.mxu1 %v1227_v15  ;;  %568 = vmatpush.bf16.msra.mxu2 %v1236_v34 }
  0x25   : > { %376 = vmatpush.bf16.msra.mxu0 %v1218_v8  ;;  %670 = vmatpush.bf16.msra.mxu3 %v1244_v62 }
  0x26   : > { %468 = vmatpush.bf16.msra.mxu1 %v1226_v16  ;;  %569 = vmatpush.bf16.msra.mxu2 %v1235_v35 }
  0x29   : > { %377 = vmatpush.bf16.msra.mxu0 %v1217_v9  ;;  %671 = vmatpush.bf16.msra.mxu3 %v1243_v63 }
  0x2a   : > { %469 = vmatpush.bf16.msra.mxu1 %v1225_v17  ;;  %570 = vmatpush.bf16.msra.mxu2 %v1234_v36 }
  0x2d   : > { %378 = vmatpush.bf16.msra.mxu0 %v1216_v10  ;;  %672 = vmatpush.bf16.msra.mxu3 %v1242_v0 }
  0x2e   : > { %470 = vmatpush.bf16.msra.mxu1 %v1224_v18  ;;  %571 = vmatpush.bf16.msra.mxu2 %v1233_v37 }
  0x30   : > { %379 = vmatmul.bf16.vlgmr.msra.gmra.mxu0 %v302_v13 }
  0x31   : > { %673 = vmatpush.bf16.msra.mxu3 %v1241_v1  ;;  %760 = vmatpush.bf16.msrb.mxu0 %v1255_v3 }
  0x32   : > { %572 = vmatpush.bf16.msra.mxu2 %v1232_v38 }
  0x35   : > { %674 = vmatpush.bf16.msra.mxu3 %v1240_v2  ;;  %761 = vmatpush.bf16.msrb.mxu0 %v1254_v4 }
  0x39   : > { %762 = vmatpush.bf16.msrb.mxu0 %v1253_v6 }
  0xad   : > { %v380_v22 = vpop.f32.mrf.mxu0 }
  0xae   : > { %v381_v23 = vadd.f32 %v1352_v21, %v380_v22 }
  0xb0   : > { %v385_v24 = vmax.f32 %v381_v23, 0.0 }
  0xb2   : > { %v387_v27 = vpack.c.bf16 %v385_v24, %v385_v24 }
  0xb4   : > { %v411_v30 = vunpack.c.l.b16 %v387_v27  ;;  %v481_v49 = vunpack.c.l.bf16 %v387_v27  ;;  %v1251_v27 = vld [vmem:[%s1707_s5 + $0x18] sm:$0xff] }
  0xb5   : > { %v382_v25 = vpop.f32.mrf.mxu0 }
  0xb6   : > { %v383_v26 = vadd.f32 %v1352_v21, %v382_v25 }
  0xb8   : > { %v386_v28 = vmax.f32 %v383_v26, 0.0  ;;  %v1252_v26 = vld [vmem:[%s1707_s5 + $0x20] sm:$0xff] }
  0xb9   : > { %763 = vmatpush.bf16.msrb.mxu0 %v1252_v26 }
  0xba   : > { %v388_v29 = vpack.c.bf16 %v386_v28, %v386_v28  ;;  %v1250_v28 = vld [vmem:[%s1707_s5 + $0x10] sm:$0xff] }
  0xbc   : > { %v412_v31 = vunpack.c.l.b16 %v388_v29  ;;  %v482_v53 = vunpack.c.l.bf16 %v388_v29  ;;  %v1249_v29 = vld [vmem:[%s1707_s5 + $0x8] sm:$0xff] }
  0xbd   : > { %764 = vmatpush.bf16.msrb.mxu0 %v1251_v27 }
  0xbe   : > { %v413_v32 = vpack.c.b16 %v412_v31, %v411_v30  ;;  %v1248_v30 = vld [vmem:[%s1707_s5] sm:$0xff] }
  0xbf   : > { %v1355_v31 = vld [vmem:[%s1706_s4 + $0x2] ss:$0 sm:$0xff] }
  0xc0   : > { %471 = vmatmul.bf16.vlgmr.msra.gmra.mxu1 %v413_v32 }
  0xc1   : > { %765 = vmatpush.bf16.msrb.mxu0 %v1250_v28 }
  0xc5   : > { %766 = vmatpush.bf16.msrb.mxu0 %v1249_v29 }
  0xc9   : > { %767 = vmatpush.bf16.msrb.mxu0 %v1248_v30 }
 0x13d   : > { %v472_v42 = vpop.f32.mrf.mxu1 }
 0x13e   : > { %v473_v43 = vadd.f32 %v1353_v41, %v472_v42 }
 0x140   : > { %v477_v44 = vmax.f32 %v473_v43, 0.0 }
 0x142   : > { %v479_v45 = vpack.c.bf16 %v477_v44, %v477_v44 }
 0x144   : > { %v483_v47 = vunpack.c.l.bf16 %v479_v45 }
 0x145   : > { %v474_v46 = vpop.f32.mrf.mxu1 }
 0x146   : > { %v475_v48 = vadd.f32 %v1353_v41, %v474_v46  ;;  %v485_v51 = vadd.f32 %v483_v47, %v481_v49 }
 0x148   : > { %v478_v50 = vmax.f32 %v475_v48, 0.0  ;;  %v487_v55 = vpack.c.bf16 %v485_v51, %v485_v51  ;;  %v1356_v48 = vld [vmem:[%s1708_s6] ss:$0 sm:$0xff] }
 0x14a   : > { %v480_v52 = vpack.c.bf16 %v478_v50, %v478_v50  ;;  %v513_v58 = vunpack.c.l.b16 %v487_v55  ;;  %v583_v14 = vunpack.c.l.bf16 %v487_v55 }
 0x14c   : > { %v484_v54 = vunpack.c.l.bf16 %v480_v52 }
 0x14e   : > { %v486_v56 = vadd.f32 %v484_v54, %v482_v53 }
 0x150   : > { %v488_v57 = vpack.c.bf16 %v486_v56, %v486_v56 }
 0x152   : > { %v514_v59 = vunpack.c.l.b16 %v488_v57  ;;  %v584_v18 = vunpack.c.l.bf16 %v488_v57 }
 0x154   : > { %v515_v60 = vpack.c.b16 %v514_v59, %v513_v58 }
 0x156   : > { %573 = vmatmul.bf16.vlgmr.msra.gmra.mxu2 %v515_v60 }
 0x1d9   : > { %v574_v7 = vpop.f32.mrf.mxu2 }
 0x1da   : > { %v575_v8 = vadd.f32 %v1354_v5, %v574_v7 }
 0x1dc   : > { %v579_v9 = vmax.f32 %v575_v8, 0.0 }
 0x1de   : > { %v581_v10 = vpack.c.bf16 %v579_v9, %v579_v9 }
 0x1e0   : > { %v585_v12 = vunpack.c.l.bf16 %v581_v10 }
 0x1e1   : > { %v576_v11 = vpop.f32.mrf.mxu2 }
 0x1e2   : > { %v577_v13 = vadd.f32 %v1354_v5, %v576_v11  ;;  %v587_v16 = vadd.f32 %v585_v12, %v583_v14 }
 0x1e4   : > { %v580_v15 = vmax.f32 %v577_v13, 0.0  ;;  %v589_v20 = vpack.c.bf16 %v587_v16, %v587_v16 }
 0x1e6   : > { %v582_v17 = vpack.c.bf16 %v580_v15, %v580_v15  ;;  %v615_v23 = vunpack.c.l.b16 %v589_v20  ;;  %v685_v41 = vunpack.c.l.bf16 %v589_v20 }
 0x1e8   : > { %v586_v19 = vunpack.c.l.bf16 %v582_v17 }
 0x1ea   : > { %v588_v21 = vadd.f32 %v586_v19, %v584_v18 }
 0x1ec   : > { %v590_v22 = vpack.c.bf16 %v588_v21, %v588_v21 }
 0x1ee   : > { %v616_v24 = vunpack.c.l.b16 %v590_v22  ;;  %v686_v42 = vunpack.c.l.bf16 %v590_v22 }
 0x1f0   : > { %v617_v25 = vpack.c.b16 %v616_v24, %v615_v23 }
 0x1f2   : > { %675 = vmatmul.bf16.vlgmr.msra.gmra.mxu3 %v617_v25 }
 0x275   : > { %v676_v32 = vpop.f32.mrf.mxu3 }
 0x276   : > { %v677_v33 = vadd.f32 %v1355_v31, %v676_v32 }
 0x278   : > { %v681_v34 = vmax.f32 %v677_v33, 0.0 }
 0x27a   : > { %v683_v36 = vpack.c.bf16 %v681_v34, %v681_v34 }
 0x27c   : > { %v687_v39 = vunpack.c.l.bf16 %v683_v36 }
 0x27d   : > { %v678_v35 = vpop.f32.mrf.mxu3 }
 0x27e   : > { %v679_v37 = vadd.f32 %v1355_v31, %v678_v35  ;;  %v689_v44 = vadd.f32 %v687_v39, %v685_v41 }
 0x280   : > { %v682_v38 = vmax.f32 %v679_v37, 0.0 }
 0x282   : > { %v684_v40 = vpack.c.bf16 %v682_v38, %v682_v38 }
 0x284   : > { %v688_v43 = vunpack.c.l.bf16 %v684_v40 }
 0x286   : > { %v690_v45 = vadd.f32 %v688_v43, %v686_v42 }
 0x288   : > { %v691_v46 = vpack.c.bf16 %v690_v45, %v689_v44 }
 0x28a   : > { %768 = vmatmul.bf16.vlgmr.msrb.gmra.mxu0 %v691_v46 }
 0x307   : > { %v769_v47 = vpop.f32.mrf.mxu0 }
 0x308   : > { %v770_v50 = vadd.f32 %v1356_v48, %v769_v47 }
 0x30f   : > { %v771_v49 = vpop.f32.mrf.mxu0 }
 0x310   : > { %v772_v51 = vadd.f32 %v1356_v48, %v771_v49  ;;  %784 = sbr.rel (!%p1510_p4) target bundleno = 828 (0x33c), region = 52 }
 0x312   : > { %v1262_v52 = vpack.c.bf16 %v772_v51, %v770_v50 }
 0x314   : > { %1263 = vst [vmem:[%s1658_s11] sm:$0xff] %v1262_v52  }
 0x315   : > { %s1715_s12 = smov (!%p787_p8, %s786_s12), 2 }
 0x316   : > { %s1201_s16 = sshll.u32 %s1715_s12, 2 }
 0x317   : > { %p1204_p9 = scmp.eq.s32.totalorder %s1201_s16, 0 }
 0x318   : > { %s1674_s17 = sshrl.u32 (!%p1204_p9), %s1715_s12, 1 }
 0x319   : > { %795 = sbr.rel (%p1204_p9) target bundleno = 828 (0x33c), region = 56  ;;  %p1205_p10 = scmp.le.s32.totalorder (!%p1204_p9), %s1674_s17, 0 }
 0x31e   : > { %954 = sbr.rel (%p1205_p10) target bundleno = 811 (0x32b), region = 132  ;;  %s1413_s27 = smov (!%p1205_p10), %s1668_s15  }
 0x31f   : > { %s1417_s9 = smov (!%p1205_p10), %s1658_s11   ;;  %s1421_s22 = smov (!%p1205_p10), 0  }
 0x320   : > { %s1425_s18 = smov (!%p1205_p10), 0  }
 0x323 LB: >> { %v812_v53 = vld [vmem:[%s1419_s9] sm:$0xf]  ;;  %v814_v54 = vld [vmem:[%s1419_s9 + $0x4] sm:$0xf]  ;;  %s816_s19 = sadd.s32 1, %s1423_s22  ;;  %s806_s18 = sadd.s32 1, %s1427_s18   ;;  %s1427_s18 = sphi %s1425_s18, %s806_s18   ;;  %s1423_s22 = sphi %s1421_s22, %s1422_s22   ;;  %s1419_s9 = sphi %s1417_s9, %s821_s9   ;;  %s1415_s27 = sphi %s1413_s27, %s822_s27  }
 0x324   : >> { %813 = vst [vmem:[%s1415_s27] sm:$0xf] %v812_v53  ;;  %p817_p11 = scmp.ge.s32.totalorder %s816_s19, %s1674_s17  ;;  %p805_p12 = scmp.ge.s32.totalorder %s806_s18, %s1674_s17 }
 0x325   : >> { %815 = vst [vmem:[%s1415_s27 + $0x4] sm:$0xf] %v814_v54 }
 0x326   : >> { %s1717_s19 = smov (%p817_p11, %s816_s19), 0  ;;  %808 = sbr.rel (!%p805_p12) target bundleno = 803 (0x323), region = 138 }
 0x327   : >> { %s1206_s20 = sshll.u32 %s1717_s19, 3  ;;  %s1422_s22 = smov %s1717_s19  }
 0x328   : >> { %s821_s9 = scalar_lea.vmem %s1658_s11, %s1206_s20 [#allocation2]   ;;  %s822_s27 = scalar_lea.vmem %s1668_s15, %s1206_s20  }
 0x32b PF: > { %s1684_s21 = sand.u32 1, %s1715_s12   ;;  %s1257_s23 = sshll.u32 %s1674_s17, 3 }
 0x32c   : > { %s827_s26 = scalar_lea.vmem %s1658_s11, %s1257_s23 [#allocation2]   ;;  %s829_s29 = scalar_lea.vmem %s1668_s15, %s1257_s23  }
 0x32d   : > { %p1211_p13 = scmp.le.s32.totalorder %s1684_s21, 0 }
 0x32e   : > { %s1429_s30 = smov (!%p1211_p13), %s829_s29   ;;  %s1433_s10 = smov (!%p1211_p13), %s827_s26  }
 0x32f   : > { %968 = sbr.rel (%p1211_p13) target bundleno = 828 (0x33c), region = 143  ;;  %s1437_s24 = smov (!%p1211_p13), 0  }
 0x330   : > { %s1441_s13 = smov (!%p1211_p13), 0  }
 0x334 LB: >> { %v839_v55 = vld [vmem:[%s1435_s10] sm:$0xf]  ;;  %s841_s12 = sadd.s32 1, %s1439_s24  ;;  %s833_s13 = sadd.s32 1, %s1443_s13   ;;  %s1443_s13 = sphi %s1441_s13, %s833_s13   ;;  %s1439_s24 = sphi %s1437_s24, %s1438_s24   ;;  %s1435_s10 = sphi %s1433_s10, %s846_s10   ;;  %s1431_s30 = sphi %s1429_s30, %s847_s30  }
 0x335   : >> { %840 = vst [vmem:[%s1431_s30] sm:$0xf] %v839_v55  ;;  %p842_p0 = scmp.ge.s32.totalorder %s841_s12, %s1684_s21  ;;  %p832_p1 = scmp.ge.s32.totalorder %s833_s13, %s1684_s21 }
 0x337   : >> { %s1719_s12 = smov (%p842_p0, %s841_s12), 0  ;;  %835 = sbr.rel (!%p832_p1) target bundleno = 820 (0x334), region = 149 }
 0x338   : >> { %s1212_s11 = sshll.u32 %s1719_s12, 2  ;;  %s1438_s24 = smov %s1719_s12  }
 0x339   : >> { %s846_s10 = scalar_lea.vmem %s827_s26, %s1212_s11 [#allocation2]   ;;  %s847_s30 = scalar_lea.vmem %s829_s29, %s1212_s11  }
 0x33c PF: > { %p14_p2 = scmp.ge.s32.totalorder %s1500_s28, 4   ;;  %s1711_s24 = smov %s1407_s25 }
 0x33d   : > { %s1712_s25 = smov %s1508_s8  ;;  %s1713_s26 = smov %s1500_s28 }
 0x33e   :  { %16 = sbr.rel (!%p14_p2) target bundleno = 2 (0x2), region = 160 }

</bundles_post_ra>
